<compile_context>
chip_gen: v7x
topology: tpu7x:2x2x1
jax: 0.10.0
libtpu: 0.0.40
codegen_flags: <defaults>
</compile_context>

<pallas_src>
import functools

import jax
import jax.numpy as jnp
from jax.experimental import pallas as pl
from jax.experimental.pallas import tpu as pltpu


# ---------------------------------------------------------------------------
# Kernel bodies: LayerNorm over the hidden dimension (nn.LayerNorm(hidden))
# ---------------------------------------------------------------------------
def _layernorm_kernel(x_ref, g_ref, b_ref, o_ref, *, eps):
    """Standard per-row LayerNorm.  Block = (tm, H); one logical row per vreg row."""
    x = x_ref[...].astype(jnp.float32)
    mean = jnp.mean(x, axis=-1, keepdims=True)
    xc = x - mean
    var = jnp.mean(xc * xc, axis=-1, keepdims=True)        # biased var (torch)
    inv = jax.lax.rsqrt(var + eps)                          # EUP rsqrt
    y = xc * inv * g_ref[...].astype(jnp.float32) + b_ref[...].astype(jnp.float32)
    o_ref[...] = y.astype(o_ref.dtype)


def _layernorm_packed_kernel(x_ref, g_ref, b_ref, seg_ref, o_ref, *, eps, h):
    """Lane-packed LayerNorm for small H (H < 128, 128 % H == 0).

    Each 128-lane row holds 128//h consecutive logical rows, so loads/stores
    are lane-dense (no masked partial stores).  Segmented mean/var are done on
    the MXU: x @ S, with S the (128,128) block-diagonal "segment ones" matrix,
    yields per-segment sums already broadcast back over the segment's lanes.
    gamma/beta arrive pre-tiled to width 128.
    """
    x = x_ref[...].astype(jnp.float32)                      # (tm, 128)
    s = seg_ref[...]                                        # (128, 128) f32
    inv_h = jnp.float32(1.0 / h)
    mean = jnp.dot(x, s, preferred_element_type=jnp.float32) * inv_h
    xc = x - mean
    var = jnp.dot(xc * xc, s, preferred_element_type=jnp.float32) * inv_h
    inv = jax.lax.rsqrt(var + eps)
    y = xc * inv * g_ref[...].astype(jnp.float32) + b_ref[...].astype(jnp.float32)
    o_ref[...] = y.astype(o_ref.dtype)


# ---------------------------------------------------------------------------
# LayerNorm wrapper
# ---------------------------------------------------------------------------
def layernorm_pallas(x2d, gamma, beta, *, eps=1e-5, tm=1024):
    """LayerNorm over the last dim of x2d: (M, H)."""
    M, H = x2d.shape
    dtype = x2d.dtype
    itemsize = jnp.dtype(dtype).itemsize

    packed = (H < 128) and (128 % H == 0) and ((M * H) % 128 == 0)
    if packed:
        W = 128
        rows = (M * H) // W
        xw = x2d.reshape(rows, W)                    # free view (row-major contiguous)
        reps = W // H
        g2 = jnp.tile(gamma, reps).reshape(1, W)
        b2 = jnp.tile(beta, reps).reshape(1, W)
        seg_idx = jnp.arange(W) // H
        seg = (seg_idx[:, None] == seg_idx[None, :]).astype(jnp.float32)  # (128,128)
        kernel = functools.partial(_layernorm_packed_kernel, eps=eps, h=H)
    else:
        W = H
        rows = M
        xw = x2d
        g2 = gamma.reshape(1, W)
        b2 = beta.reshape(1, W)
        kernel = functools.partial(_layernorm_kernel, eps=eps)

    # Tile sizing: biggest tm that (a) does not exceed the row count, and
    # (b) keeps double-buffered in+out tiles + fp32 intermediates under a
    # budget sized for v7x's 64 MiB VMEM (v5e/v6e have 128 MiB, so this is
    # conservative everywhere).  Per-step overhead (~0.35 us) amortizes below
    # ~10% at tm >= 1024 for typical H.
    VMEM_TILE_BUDGET = 48 * 1024 * 1024
    max_tm_vmem = max(8, VMEM_TILE_BUDGET // (6 * W * itemsize))
    tm_eff = max(8, (min(tm, rows, max_tm_vmem) // 8) * 8)
    n_tiles = pl.cdiv(rows, tm_eff)
    # NOTE(v7x): the single "parallel" row axis is sharded across 2 TensorCores;
    # for very large problems prefer tm that yields an even n_tiles >= 4.

    block_bytes = tm_eff * W * itemsize
    vmem_limit = int(min(64 * 1024 * 1024, max(32 * 1024 * 1024, 6 * block_bytes)))

    row_spec = pl.BlockSpec((tm_eff, W), lambda i: (i, 0))
    inv_spec = pl.BlockSpec((1, W), lambda i: (0, 0))        # grid-invariant params

    if packed:
        in_specs = [row_spec, inv_spec, inv_spec,
                    pl.BlockSpec((W, W), lambda i: (0, 0))]
        args = (xw, g2, b2, seg)
    else:
        in_specs = [row_spec, inv_spec, inv_spec]
        args = (xw, g2, b2)

    out = pl.pallas_call(
        kernel,
        out_shape=jax.ShapeDtypeStruct((rows, W), dtype),
        grid=(n_tiles,),
        in_specs=in_specs,
        out_specs=row_spec,
        compiler_params=pltpu.CompilerParams(
            dimension_semantics=("parallel",),
            vmem_limit_bytes=vmem_limit),
    )(*args)

    return out.reshape(M, H) if packed else out


# ---------------------------------------------------------------------------
# Mask construction (plain JAX: a few KB of int32, not worth a pallas_call)
#   out[b, s, t] = attn_mask[b, s] if t < for_mask else 0
# ---------------------------------------------------------------------------
def build_mask(attn_mask_bs_seq, *, total, for_mask):
    bs, seq = attn_mask_bs_seq.shape
    am = attn_mask_bs_seq.astype(jnp.int32)[:, :, None]
    t_idx = jax.lax.broadcasted_iota(jnp.int32, (bs, seq, total), 2)
    mask3 = jnp.where(t_idx < for_mask, am, jnp.int32(0))
    return mask3.reshape(bs, seq * total)


# ---------------------------------------------------------------------------
# Host-side token bookkeeping (pure Python, mirrors Mask.count_tokens)
# ---------------------------------------------------------------------------
def count_tokens(*, n_patch_latents, use_hand_rgb, act_pred, fwd_pred,
                 fwd_pred_hand, chunk_size):
    tokens = {"lang": 1, "state": 1, "patch": n_patch_latents, "obs": 1}
    total = sum(tokens.values())
    total += (tokens["obs"] + tokens["patch"]) if use_hand_rgb else 0
    tokens["for_mask"] = total
    starts = {}
    if act_pred:
        starts["act"] = total
        total += chunk_size
    if fwd_pred:
        starts["obs"] = total
        total += tokens["patch"] + tokens["obs"]
        if fwd_pred_hand:
            starts["obs_hand"] = total
            total += tokens["patch"] + tokens["obs"]
    tokens["total"] = total
    return tokens, starts


# ---------------------------------------------------------------------------
# Mask.__call__ -> Mask.original(stack, attn_mask)
# ---------------------------------------------------------------------------
def mask_forward(params, stack, attn_mask, *, hidden_size, seq, chunk_size,
                 n_patch_latents, use_hand_rgb=True, act_pred=True,
                 fwd_pred=True, fwd_pred_hand=True, eps=1e-5, tm=1024):
    bs = stack.shape[0]
    tokens, starts = count_tokens(
        n_patch_latents=n_patch_latents, use_hand_rgb=use_hand_rgb,
        act_pred=act_pred, fwd_pred=fwd_pred, fwd_pred_hand=fwd_pred_hand,
        chunk_size=chunk_size)
    total = tokens["total"]

    # stack = lnorm(stack.reshape(bs, total*seq, hidden))
    flat = stack.reshape(bs * total * seq, hidden_size)
    normed = layernorm_pallas(flat, params["gamma"], params["beta"],
                              eps=eps, tm=tm)
    stack_out = normed.reshape(bs, total * seq, hidden_size)

    # attention mask: real tokens keep attn_mask, query tokens are zero
    mask = build_mask(attn_mask.reshape(bs, seq), total=total,
                      for_mask=tokens["for_mask"])

    return stack_out, mask, tokens, starts


# ---------------------------------------------------------------------------
# Demo / self-check
# ---------------------------------------------------------------------------
if __name__ == "__main__":
    hidden_size = 32
    seq = 8
    chunk_size = 4
    n_patch_latents = 9
    bs = 2
    use_hand_rgb = True

    tokens, starts = count_tokens(
        n_patch_latents=n_patch_latents, use_hand_rgb=use_hand_rgb,
        act_pred=True, fwd_pred=True, fwd_pred_hand=True,
        chunk_size=chunk_size)
    total = tokens["total"]            # 46 with these settings

    root = jax.random.PRNGKey(0)
    k_stack, k_mask, k_x2 = jax.random.split(root, 3)
    stack = jax.random.normal(k_stack, (bs, seq, total, hidden_size),
                              jnp.float32)
    attn_mask = (jax.random.uniform(k_mask, (bs, seq)) > 0.3).astype(jnp.int32)

    # LayerNorm params (PyTorch default init: weight=1, bias=0)
    params = {"gamma": jnp.ones((hidden_size,), jnp.float32),
              "beta": jnp.zeros((hidden_size,), jnp.float32)}

    stack_out, mask, tokens, starts = mask_forward(
        params, stack, attn_mask,
        hidden_size=hidden_size, seq=seq, chunk_size=chunk_size,
        n_patch_latents=n_patch_latents, use_hand_rgb=use_hand_rgb)

    jax.block_until_ready(stack_out)
    jax.block_until_ready(mask)

    # ---- reference (pure JAX) check: packed (H=32) path ------------------
    x = stack.reshape(bs, total * seq, hidden_size).astype(jnp.float32)
    mean = jnp.mean(x, axis=-1, keepdims=True)
    var = jnp.mean((x - mean) ** 2, axis=-1, keepdims=True)
    ref_stack = (x - mean) / jnp.sqrt(var + 1e-5) * params["gamma"] + params["beta"]

    ref_mask3 = jnp.concatenate(
        [jnp.repeat(attn_mask[:, :, None], tokens["for_mask"], axis=2),
         jnp.zeros((bs, seq, total - tokens["for_mask"]), jnp.int32)], axis=2)
    ref_mask = ref_mask3.reshape(bs, total * seq)

    assert stack_out.shape == (bs, total * seq, hidden_size)
    assert mask.shape == (bs, total * seq)
    assert jnp.max(jnp.abs(stack_out - ref_stack)) < 1e-4
    assert bool(jnp.all(mask == ref_mask))
    assert starts["act"] == tokens["for_mask"]

    # ---- also exercise the standard (H >= 128) kernel path with a ragged
    # final block (no pad / no slice in the wrapper) -----------------------
    M2, H2 = 300, 256
    x2 = jax.random.normal(k_x2, (M2, H2), jnp.float32)
    g2 = jax.random.normal(jax.random.PRNGKey(1), (H2,), jnp.float32)
    b2 = jax.random.normal(jax.random.PRNGKey(2), (H2,), jnp.float32)
    y2 = layernorm_pallas(x2, g2, b2, tm=128)
    jax.block_until_ready(y2)
    m2 = jnp.mean(x2, axis=-1, keepdims=True)
    v2 = jnp.mean((x2 - m2) ** 2, axis=-1, keepdims=True)
    ref2 = (x2 - m2) * jax.lax.rsqrt(v2 + 1e-5) * g2 + b2
    assert jnp.max(jnp.abs(y2 - ref2)) < 1e-4

    print("KERNEL_OK")
</pallas_src>

<mosaic_0001>
module attributes {stable_mosaic.version = 11 : i64} {
  func.func @_layernorm_packed_kernel(%arg0: i32, %arg1: memref<184x128xf32, #tpu.memory_space<vmem>>, %arg2: memref<1x128xf32, #tpu.memory_space<vmem>>, %arg3: memref<1x128xf32, #tpu.memory_space<vmem>>, %arg4: memref<128x128xf32, #tpu.memory_space<vmem>>, %arg5: memref<184x128xf32, #tpu.memory_space<vmem>>) attributes {dimension_semantics = [#tpu.dimension_semantics<parallel>], iteration_bounds = array<i64: 1>, scalar_prefetch = 0 : i64, scratch_operands = 0 : i64, tpu.core_type = #tpu.core_type<tc>, window_params = [{transform_indices = @transform_0, window_bounds = array<i64: 184, 128>}, {pipeline_mode = #tpu.pipeline_mode<synchronous>, transform_indices = @transform_1, window_bounds = array<i64: 1, 128>}, {pipeline_mode = #tpu.pipeline_mode<synchronous>, transform_indices = @transform_2, window_bounds = array<i64: 1, 128>}, {pipeline_mode = #tpu.pipeline_mode<synchronous>, transform_indices = @transform_3, window_bounds = array<i64: 128, 128>}, {transform_indices = @transform_4, window_bounds = array<i64: 184, 128>}]} {
    %c0 = arith.constant 0 : index
    %c0_0 = arith.constant 0 : index
    %0 = vector.load %arg1[%c0, %c0_0] : memref<184x128xf32, #tpu.memory_space<vmem>>, vector<184x128xf32>
    %c0_1 = arith.constant 0 : index
    %c0_2 = arith.constant 0 : index
    %1 = vector.load %arg4[%c0_1, %c0_2] : memref<128x128xf32, #tpu.memory_space<vmem>>, vector<128x128xf32>
    %cst = arith.constant dense<0.000000e+00> : vector<184x128xf32>
    %2 = tpu.matmul %0, %1, %cst {dimension_numbers = #tpu.dot_dimension_numbers<[1], [0], [0], [1], [0, 0, 1, 1], [], []>} : vector<184x128xf32>, vector<128x128xf32>, vector<184x128xf32> -> vector<184x128xf32>
    %cst_3 = arith.constant 3.125000e-02 : f32
    %3 = vector.broadcast %cst_3 : f32 to vector<184x128xf32>
    %4 = arith.mulf %2, %3 : vector<184x128xf32>
    %5 = arith.subf %0, %4 : vector<184x128xf32>
    %6 = arith.mulf %5, %5 : vector<184x128xf32>
    %cst_4 = arith.constant dense<0.000000e+00> : vector<184x128xf32>
    %7 = tpu.matmul %6, %1, %cst_4 {dimension_numbers = #tpu.dot_dimension_numbers<[1], [0], [0], [1], [0, 0, 1, 1], [], []>} : vector<184x128xf32>, vector<128x128xf32>, vector<184x128xf32> -> vector<184x128xf32>
    %cst_5 = arith.constant 3.125000e-02 : f32
    %8 = vector.broadcast %cst_5 : f32 to vector<184x128xf32>
    %9 = arith.mulf %7, %8 : vector<184x128xf32>
    %cst_6 = arith.constant 9.99999974E-6 : f32
    %10 = vector.broadcast %cst_6 : f32 to vector<184x128xf32>
    %11 = arith.addf %9, %10 : vector<184x128xf32>
    %12 = math.rsqrt %11 : vector<184x128xf32>
    %13 = arith.mulf %5, %12 : vector<184x128xf32>
    %c0_7 = arith.constant 0 : index
    %c0_8 = arith.constant 0 : index
    %14 = vector.load %arg2[%c0_7, %c0_8] : memref<1x128xf32, #tpu.memory_space<vmem>>, vector<1x128xf32>
    %15 = vector.broadcast %14 : vector<1x128xf32> to vector<184x128xf32>
    %16 = arith.mulf %13, %15 : vector<184x128xf32>
    %c0_9 = arith.constant 0 : index
    %c0_10 = arith.constant 0 : index
    %17 = vector.load %arg3[%c0_9, %c0_10] : memref<1x128xf32, #tpu.memory_space<vmem>>, vector<1x128xf32>
    %18 = vector.broadcast %17 : vector<1x128xf32> to vector<184x128xf32>
    %19 = arith.addf %16, %18 : vector<184x128xf32>
    %c0_11 = arith.constant 0 : index
    %c0_12 = arith.constant 0 : index
    %20 = vector.load %arg5[%c0_11, %c0_12] : memref<184x128xf32, #tpu.memory_space<vmem>>, vector<184x128xf32>
    tpu.vector_store %arg5[%c0_11, %c0_12], %19 {strides = array<i32>} : memref<184x128xf32, #tpu.memory_space<vmem>>, vector<184x128xf32>,
    return
  }
  func.func @transform_0(%arg0: i32) -> (i32, i32) {
    %c0_i32 = arith.constant 0 : i32
    %c0_i32_0 = arith.constant 0 : i32
    return %arg0, %c0_i32 : i32, i32
  }
  func.func @transform_1(%arg0: i32) -> (i32, i32) {
    %c0_i32 = arith.constant 0 : i32
    %c0_i32_0 = arith.constant 0 : i32
    %c0_i32_1 = arith.constant 0 : i32
    return %c0_i32, %c0_i32_0 : i32, i32
  }
  func.func @transform_2(%arg0: i32) -> (i32, i32) {
    %c0_i32 = arith.constant 0 : i32
    %c0_i32_0 = arith.constant 0 : i32
    %c0_i32_1 = arith.constant 0 : i32
    return %c0_i32, %c0_i32_0 : i32, i32
  }
  func.func @transform_3(%arg0: i32) -> (i32, i32) {
    %c0_i32 = arith.constant 0 : i32
    %c0_i32_0 = arith.constant 0 : i32
    %c0_i32_1 = arith.constant 0 : i32
    return %c0_i32, %c0_i32_0 : i32, i32
  }
  func.func @transform_4(%arg0: i32) -> (i32, i32) {
    %c0_i32 = arith.constant 0 : i32
    %c0_i32_0 = arith.constant 0 : i32
    return %arg0, %c0_i32 : i32, i32
  }
}

</mosaic_0001>

<bundles_post_ra>
// kernel: tpu_custom_call.1
= control target key start
LH: loop header
LB: loop body
LE: loop exit
PB: predicated region body
PF: predicated region fallthrough
CT: control target
= control target key end

     0   :  { %9 = vsyncpa [#allocation3], 0  ;;  %s1596_s0 = inlined_call_operand.hbm [shape: f32[184,128], index: 0, kind: input, shape index: {}]   ;;  %s1597_s1 = inlined_call_operand.vmem [shape: f32[1,128], index: 1, kind: input, shape index: {}]   ;;  %s1598_s2 = inlined_call_operand.vmem [shape: f32[1,128], index: 2, kind: input, shape index: {}]   ;;  %s1599_s3 = inlined_call_operand.hbm [shape: f32[128,128], index: 3, kind: input, shape index: {}]   ;;  %s1600_s4 = inlined_call_operand.hbm [shape: f32[184,128], index: 4, kind: output, shape index: {}]  }
   0x1   :  { %10 = vsyncpa [#allocation6], 0 }
   0x2   :  { %11 = vsyncpa [#allocation4], 0  ;;  %s1163_s15 = smov [#allocation2]   ;;  %s1091_s19 = scalar_lea.hbm %s1596_s0, 2944 }
   0x3   :  { %s17_s16 = sshll.u32 %s1163_s15, 4  ;;  %p1092_p0 = scmp.ne.s32.totalorder %s1596_s0, %s1091_s19  ;;  %s18_s16 = int_to_ptr.vmem [resolvable:$true] %s17_s16 }
   0x4   :  { %p1095_p1 = scmp.lt.u32.totalorder %s1091_s19, %s1596_s0 }
   0x6   :  { %p1097_p2 = pnand %p1095_p1, %p1092_p0 }
   0x8   :  { %1100 = shalt.err (!%p1097_p2)
}
   0x9   :  { %s1101_s24 = scalar_lea.vmem %s18_s16, 2944  ;;  %p1106_p4 = scmp.lt.s32.totalorder %s18_s16, %s18_s16 }
   0xa   :  { %p1102_p3 = scmp.ne.s32.totalorder %s18_s16, %s1101_s24  ;;  %p1107_p5 = scmp.lt.s32.totalorder %s1101_s24, %s1101_s24 }
   0xc   :  { %p1108_p6 = por %p1107_p5, %p1106_p4 }
   0xe   :  { %p1109_p7 = pnand %p1108_p6, %p1102_p3 }
  0x10   :  { %1112 = shalt.err (!%p1109_p7)
}
  0x11   :  { %s1164_s25 = smov 128   ;;  %s1165_s26 = smov 8  }
  0x12   :  { %23 = dma.hbm_to_vmem [thread:$0]  %s1596_s0, 2944, %s18_s16, [#allocation3], %s1164_s25, %s1164_s25, %s1165_s26  }
  0x13   :  { %s1166_s29 = smov [#allocation5]   ;;  %s1113_s7 = scalar_lea.hbm %s1599_s3, 2048 }
  0x14   :  { %s33_s30 = sshll.u32 %s1166_s29, 4  ;;  %p1114_p8 = scmp.ne.s32.totalorder %s1599_s3, %s1113_s7  ;;  %s34_s30 = int_to_ptr.vmem [resolvable:$true] %s33_s30 }
  0x15   :  { %p1117_p9 = scmp.lt.u32.totalorder %s1113_s7, %s1599_s3 }
  0x17   :  { %p1119_p10 = pnand %p1117_p9, %p1114_p8 }
  0x19   :  { %1122 = shalt.err (!%p1119_p10)
}
  0x1a   :  { %s1123_s12 = scalar_lea.vmem %s34_s30, 2048  ;;  %p1128_p12 = scmp.lt.s32.totalorder %s34_s30, %s34_s30 }
  0x1b   :  { %p1124_p11 = scmp.ne.s32.totalorder %s34_s30, %s1123_s12  ;;  %p1129_p13 = scmp.lt.s32.totalorder %s1123_s12, %s1123_s12 }
  0x1d   :  { %p1130_p0 = por %p1129_p13, %p1128_p12 }
  0x1f   :  { %p1131_p1 = pnand %p1130_p0, %p1124_p11 }
  0x21   :  { %1134 = shalt.err (!%p1131_p1)
}
  0x22   :  { %39 = dma.hbm_to_vmem [thread:$0]  %s1599_s3, 2048, %s34_s30, [#allocation6], %s1164_s25, %s1164_s25, %s1165_s26  }
  0x23   :  { %1157 = dma.done.wait [#allocation3], 2944  }
  0x24   :  { %1158 = vsyncadd [#allocation3], 4294964352 }
  0x25   :  { %1159 = dma.done.wait [#allocation6], 2048  }
  0x26   :  { %1160 = vsyncadd [#allocation6], 4294965248  ;;  %v1167_v0 = vmov 0.0|0.0   ;;  %vm1168_vm0 = vmmov 0   ;;  %v1169_v1 = vmov 0.0   ;;  %v69_v2 = vld [vmem:[#allocation5] sm:$0xff] }
  0x27   :  { %989 = vmatprep.subr.bf16.mxu0 %v1167_v0  ;;  %819 = vmatprep.mubr.msk.f32.mxu0 %vm1168_vm0, %v1169_v1  ;;  %v70_v3 = vld [vmem:[#allocation5 + $0x8] sm:$0xff]  ;;  %v71_v4 = vld [vmem:[#allocation5 + $0x10] sm:$0xff]  ;;  %v72_v6 = vld [vmem:[#allocation5 + $0x18] sm:$0xff] }
  0x28   :  { %1013 = vmatprep.subr.bf16.mxu1 %v1167_v0  ;;  %920 = vmatprep.mubr.msk.f32.mxu1 %vm1168_vm0, %v1169_v1  ;;  %v990_v5 = vpack.c.bf16 %v70_v3, %v69_v2  ;;  %v993_v7 = vpack.c.bf16 %v72_v6, %v71_v4  ;;  %v73_v8 = vld [vmem:[#allocation5 + $0x20] sm:$0xff]  ;;  %v74_v9 = vld [vmem:[#allocation5 + $0x28] sm:$0xff]  ;;  %v75_v11 = vld [vmem:[#allocation5 + $0x30] sm:$0xff] }
  0x29   :  { %v996_v10 = vpack.c.bf16 %v74_v9, %v73_v8  ;;  %v76_v12 = vld [vmem:[#allocation5 + $0x38] sm:$0xff]  ;;  %v77_v14 = vld [vmem:[#allocation5 + $0x40] sm:$0xff]  ;;  %v78_v15 = vld [vmem:[#allocation5 + $0x48] sm:$0xff] }
  0x2a   :  { %991 = vmatpush3.bf16.msra.mxu0 %v990_v5  ;;  %1015 = vmatpush3.bf16.msra.mxu1 %v990_v5  ;;  %v999_v13 = vpack.c.bf16 %v76_v12, %v75_v11  ;;  %v1002_v16 = vpack.c.bf16 %v78_v15, %v77_v14  ;;  %v79_v17 = vld [vmem:[#allocation5 + $0x50] sm:$0xff]  ;;  %v80_v18 = vld [vmem:[#allocation5 + $0x58] sm:$0xff]  ;;  %v81_v20 = vld [vmem:[#allocation5 + $0x60] sm:$0xff] }
  0x2b   :  { %992 = vmatprep.subr.bf16.mxu0 %v1167_v0  ;;  %1016 = vmatprep.subr.bf16.mxu1 %v1167_v0  ;;  %v1005_v19 = vpack.c.bf16 %v80_v18, %v79_v17  ;;  %v82_v21 = vld [vmem:[#allocation5 + $0x68] sm:$0xff]  ;;  %v83_v23 = vld [vmem:[#allocation5 + $0x70] sm:$0xff]  ;;  %v84_v24 = vld [vmem:[#allocation5 + $0x78] sm:$0xff] }
  0x2c   :  { %v1008_v22 = vpack.c.bf16 %v82_v21, %v81_v20  ;;  %v1011_v25 = vpack.c.bf16 %v84_v24, %v83_v23  ;;  %v1230_v26 = vld [vmem:[#allocation2] sm:$0xff]  ;;  %v1235_v27 = vld [vmem:[#allocation2 + $0x8] sm:$0xff]  ;;  %v1240_v28 = vld [vmem:[#allocation2 + $0x10] sm:$0xff] }
  0x2d   :  { %v1245_v29 = vld [vmem:[#allocation2 + $0x18] sm:$0xff]  ;;  %v1250_v30 = vld [vmem:[#allocation2 + $0x20] sm:$0xff]  ;;  %v1255_v31 = vld [vmem:[#allocation2 + $0x28] sm:$0xff] }
  0x2e   :  { %994 = vmatpush3.bf16.msra.mxu0 %v993_v7  ;;  %1018 = vmatpush3.bf16.msra.mxu1 %v993_v7  ;;  %v1260_v32 = vld [vmem:[#allocation2 + $0x30] sm:$0xff]  ;;  %v1265_v33 = vld [vmem:[#allocation2 + $0x38] sm:$0xff]  ;;  %v1270_v34 = vld [vmem:[#allocation2 + $0x40] sm:$0xff] }
  0x2f   :  { %995 = vmatprep.subr.bf16.mxu0 %v1167_v0  ;;  %1019 = vmatprep.subr.bf16.mxu1 %v1167_v0  ;;  %v1275_v35 = vld [vmem:[#allocation2 + $0x48] sm:$0xff]  ;;  %v1280_v36 = vld [vmem:[#allocation2 + $0x50] sm:$0xff]  ;;  %v1285_v37 = vld [vmem:[#allocation2 + $0x58] sm:$0xff] }
  0x30   :  { %v1290_v38 = vld [vmem:[#allocation2 + $0x60] sm:$0xff]  ;;  %v1295_v39 = vld [vmem:[#allocation2 + $0x68] sm:$0xff]  ;;  %v1300_v40 = vld [vmem:[#allocation2 + $0x70] sm:$0xff] }
  0x31   :  { %v1305_v41 = vld [vmem:[#allocation2 + $0x78] sm:$0xff]  ;;  %v1310_v42 = vld [vmem:[#allocation2 + $0x80] sm:$0xff]  ;;  %v1315_v43 = vld [vmem:[#allocation2 + $0x88] sm:$0xff] }
  0x32   :  { %997 = vmatpush3.bf16.msra.mxu0 %v996_v10  ;;  %1021 = vmatpush3.bf16.msra.mxu1 %v996_v10  ;;  %v1320_v44 = vld [vmem:[#allocation2 + $0x90] sm:$0xff]  ;;  %v1325_v45 = vld [vmem:[#allocation2 + $0x98] sm:$0xff]  ;;  %v1330_v46 = vld [vmem:[#allocation2 + $0xa0] sm:$0xff] }
  0x33   :  { %998 = vmatprep.subr.bf16.mxu0 %v1167_v0  ;;  %1022 = vmatprep.subr.bf16.mxu1 %v1167_v0  ;;  %v1335_v47 = vld [vmem:[#allocation2 + $0xa8] sm:$0xff]  ;;  %v1340_v48 = vld [vmem:[#allocation2 + $0xb0] sm:$0xff] }
  0x36   :  { %1000 = vmatpush3.bf16.msra.mxu0 %v999_v13  ;;  %1024 = vmatpush3.bf16.msra.mxu1 %v999_v13 }
  0x37   :  { %1001 = vmatprep.subr.bf16.mxu0 %v1167_v0  ;;  %1025 = vmatprep.subr.bf16.mxu1 %v1167_v0 }
  0x3a   :  { %1003 = vmatpush3.bf16.msra.mxu0 %v1002_v16  ;;  %1027 = vmatpush3.bf16.msra.mxu1 %v1002_v16 }
  0x3b   :  { %1004 = vmatprep.subr.bf16.mxu0 %v1167_v0  ;;  %1028 = vmatprep.subr.bf16.mxu1 %v1167_v0 }
  0x3e   :  { %1006 = vmatpush3.bf16.msra.mxu0 %v1005_v19  ;;  %1030 = vmatpush3.bf16.msra.mxu1 %v1005_v19 }
  0x3f   :  { %1007 = vmatprep.subr.bf16.mxu0 %v1167_v0  ;;  %1031 = vmatprep.subr.bf16.mxu1 %v1167_v0 }
  0x42   :  { %1009 = vmatpush3.bf16.msra.mxu0 %v1008_v22  ;;  %1033 = vmatpush3.bf16.msra.mxu1 %v1008_v22 }
  0x43   :  { %1010 = vmatprep.subr.bf16.mxu0 %v1167_v0  ;;  %1034 = vmatprep.subr.bf16.mxu1 %v1167_v0 }
  0x46   :  { %1012 = vmatpush3.bf16.msra.mxu0 %v1011_v25  ;;  %1036 = vmatpush3.bf16.msra.mxu1 %v1011_v25 }
  0x49   :  { %820 = vmatmul.mubr.f32.vlgmr.msra.gmra.mrb[0].mxu0 %v1230_v26 }
  0x4a   :  { %822 = vmatprep.mubr.msk.f32.mxu0 %vm1168_vm0, %v1169_v1 }
  0x4d   :  { %823 = vmatmul.mubr.f32.gmra.mrb[2].mxu0 %v1235_v27 }
  0x4e   :  { %825 = vmatprep.mubr.msk.f32.mxu0 %vm1168_vm0, %v1169_v1 }
  0x51   :  { %826 = vmatmul.mubr.f32.gmra.mrb[4].mxu0 %v1240_v28 }
  0x52   :  { %828 = vmatprep.mubr.msk.f32.mxu0 %vm1168_vm0, %v1169_v1 }
  0x55   :  { %829 = vmatmul.mubr.f32.gmra.mrb[6].mxu0 %v1245_v29 }
  0x56   :  { %831 = vmatprep.mubr.msk.f32.mxu0 %vm1168_vm0, %v1169_v1 }
  0x59   :  { %832 = vmatmul.mubr.f32.gmra.mrb[8].mxu0 %v1250_v30 }
  0x5a   :  { %834 = vmatprep.mubr.msk.f32.mxu0 %vm1168_vm0, %v1169_v1 }
  0x5d   :  { %835 = vmatmul.mubr.f32.gmra.mrb[10].mxu0 %v1255_v31 }
  0x5e   :  { %837 = vmatprep.mubr.msk.f32.mxu0 %vm1168_vm0, %v1169_v1 }
  0x61   :  { %838 = vmatmul.mubr.f32.gmra.mrb[12].mxu0 %v1260_v32 }
  0x62   :  { %840 = vmatprep.mubr.msk.f32.mxu0 %vm1168_vm0, %v1169_v1 }
  0x65   :  { %841 = vmatmul.mubr.f32.gmra.mrb[14].mxu0 %v1265_v33 }
  0x66   :  { %843 = vmatprep.mubr.msk.f32.mxu0 %vm1168_vm0, %v1169_v1 }
  0x69   :  { %844 = vmatmul.mubr.f32.gmra.mrb[16].mxu0 %v1270_v34 }
  0x6a   :  { %846 = vmatprep.mubr.msk.f32.mxu0 %vm1168_vm0, %v1169_v1 }
  0x6d   :  { %847 = vmatmul.mubr.f32.gmra.mrb[18].mxu0 %v1275_v35 }
  0x6e   :  { %849 = vmatprep.mubr.msk.f32.mxu0 %vm1168_vm0, %v1169_v1 }
  0x71   :  { %850 = vmatmul.mubr.f32.gmra.mrb[20].mxu0 %v1280_v36 }
  0x72   :  { %852 = vmatprep.mubr.msk.f32.mxu0 %vm1168_vm0, %v1169_v1 }
  0x75   :  { %853 = vmatmul.mubr.f32.gmra.mrb[22].mxu0 %v1285_v37 }
  0x76   :  { %855 = vmatprep.mubr.msk.f32.mxu0 %vm1168_vm0, %v1169_v1 }
  0x79   :  { %856 = vmatmul.mubr.f32.gmra.mrb[24].mxu0 %v1290_v38 }
  0x7a   :  { %858 = vmatprep.mubr.msk.f32.mxu0 %vm1168_vm0, %v1169_v1 }
  0x7d   :  { %859 = vmatmul.mubr.f32.gmra.mrb[26].mxu0 %v1295_v39 }
  0x7e   :  { %861 = vmatprep.mubr.msk.f32.mxu0 %vm1168_vm0, %v1169_v1 }
  0x81   :  { %862 = vmatmul.mubr.f32.gmra.mrb[28].mxu0 %v1300_v40 }
  0x82   :  { %864 = vmatprep.mubr.msk.f32.mxu0 %vm1168_vm0, %v1169_v1 }
  0x85   :  { %865 = vmatmul.mubr.f32.gmra.mrb[30].mxu0 %v1305_v41 }
  0x86   :  { %867 = vmatprep.mubr.msk.f32.mxu0 %vm1168_vm0, %v1169_v1 }
  0x89   :  { %868 = vmatmul.mubr.f32.gmra.mrb[32].mxu0 %v1310_v42 }
  0x8a   :  { %870 = vmatprep.mubr.msk.f32.mxu0 %vm1168_vm0, %v1169_v1 }
  0x8d   :  { %871 = vmatmul.mubr.f32.gmra.mrb[34].mxu0 %v1315_v43 }
  0x8e   :  { %873 = vmatprep.mubr.msk.f32.mxu0 %vm1168_vm0, %v1169_v1 }
  0x91   :  { %874 = vmatmul.mubr.f32.gmra.mrb[36].mxu0 %v1320_v44 }
  0x92   :  { %876 = vmatprep.mubr.msk.f32.mxu0 %vm1168_vm0, %v1169_v1 }
  0x95   :  { %877 = vmatmul.mubr.f32.gmra.mrb[38].mxu0 %v1325_v45 }
  0x96   :  { %879 = vmatprep.mubr.msk.f32.mxu0 %vm1168_vm0, %v1169_v1 }
  0x99   :  { %880 = vmatmul.mubr.f32.gmra.mrb[40].mxu0 %v1330_v46 }
  0x9a   :  { %882 = vmatprep.mubr.msk.f32.mxu0 %vm1168_vm0, %v1169_v1 }
  0x9d   :  { %883 = vmatmul.mubr.f32.gmra.mrb[42].mxu0 %v1335_v47 }
  0x9e   :  { %885 = vmatprep.mubr.msk.f32.mxu0 %vm1168_vm0, %v1169_v1 }
  0xa1   :  { %886 = vmatmul.mubr.f32.gmra.mrb[44].mxu0 %v1340_v48 }
 0x11c   :  { %v151_v49 = vpop.f32.mrb[0].mxu0 }
 0x11d   :  { %v265_v50 = vmul.f32 0.03125, %v151_v49  ;;  %v821_v51 = vpop.f32.mrb[1].mxu0 }
 0x11f   :  { %v1344_v52 = vsub.f32 %v1230_v26, %v265_v50 }
 0x120   :  { %v156_v53 = vpop.f32.mrb[2].mxu0 }
 0x121   :  { %v266_v54 = vmul.f32 0.03125, %v156_v53  ;;  %v824_v55 = vpop.f32.mrb[3].mxu0  ;;  %v311_v56 = vmul.f32 %v1344_v52, %v1344_v52 }
 0x123   :  { %v1349_v57 = vsub.f32 %v1235_v27, %v266_v54  ;;  %921 = vmatmul.mubr.f32.vlgmr.msra.gmra.mrb[0].mxu1 %v311_v56 }
 0x124   :  { %v161_v58 = vpop.f32.mrb[4].mxu0  ;;  %923 = vmatprep.mubr.msk.f32.mxu1 %vm1168_vm0, %v1169_v1 }
 0x125   :  { %v267_v59 = vmul.f32 0.03125, %v161_v58  ;;  %v827_v60 = vpop.f32.mrb[5].mxu0  ;;  %v312_v61 = vmul.f32 %v1349_v57, %v1349_v57 }
 0x127   :  { %v1356_v62 = vsub.f32 %v1240_v28, %v267_v59  ;;  %924 = vmatmul.mubr.f32.gmra.mrb[2].mxu1 %v312_v61 }
 0x128   :  { %v166_v63 = vpop.f32.mrb[6].mxu0  ;;  %926 = vmatprep.mubr.msk.f32.mxu1 %vm1168_vm0, %v1169_v1 }
 0x129   :  { %v268_v0 = vmul.f32 0.03125, %v166_v63  ;;  %v830_v2 = vpop.f32.mrb[7].mxu0  ;;  %v313_v3 = vmul.f32 %v1356_v62, %v1356_v62 }
 0x12b   :  { %v1363_v4 = vsub.f32 %v1245_v29, %v268_v0  ;;  %927 = vmatmul.mubr.f32.gmra.mrb[4].mxu1 %v313_v3 }
 0x12c   :  { %v171_v5 = vpop.f32.mrb[8].mxu0  ;;  %929 = vmatprep.mubr.msk.f32.mxu1 %vm1168_vm0, %v1169_v1 }
 0x12d   :  { %v269_v6 = vmul.f32 0.03125, %v171_v5  ;;  %v833_v7 = vpop.f32.mrb[9].mxu0  ;;  %v314_v8 = vmul.f32 %v1363_v4, %v1363_v4 }
 0x12f   :  { %v1370_v9 = vsub.f32 %v1250_v30, %v269_v6  ;;  %930 = vmatmul.mubr.f32.gmra.mrb[6].mxu1 %v314_v8 }
 0x130   :  { %v176_v10 = vpop.f32.mrb[10].mxu0  ;;  %932 = vmatprep.mubr.msk.f32.mxu1 %vm1168_vm0, %v1169_v1 }
 0x131   :  { %v270_v11 = vmul.f32 0.03125, %v176_v10  ;;  %v836_v12 = vpop.f32.mrb[11].mxu0  ;;  %v315_v13 = vmul.f32 %v1370_v9, %v1370_v9 }
 0x133   :  { %v1377_v14 = vsub.f32 %v1255_v31, %v270_v11  ;;  %933 = vmatmul.mubr.f32.gmra.mrb[8].mxu1 %v315_v13 }
 0x134   :  { %v181_v15 = vpop.f32.mrb[12].mxu0  ;;  %935 = vmatprep.mubr.msk.f32.mxu1 %vm1168_vm0, %v1169_v1 }
 0x135   :  { %v271_v16 = vmul.f32 0.03125, %v181_v15  ;;  %v839_v17 = vpop.f32.mrb[13].mxu0  ;;  %v316_v18 = vmul.f32 %v1377_v14, %v1377_v14 }
 0x137   :  { %v1384_v19 = vsub.f32 %v1260_v32, %v271_v16  ;;  %936 = vmatmul.mubr.f32.gmra.mrb[10].mxu1 %v316_v18 }
 0x138   :  { %v186_v20 = vpop.f32.mrb[14].mxu0  ;;  %938 = vmatprep.mubr.msk.f32.mxu1 %vm1168_vm0, %v1169_v1 }
 0x139   :  { %v272_v21 = vmul.f32 0.03125, %v186_v20  ;;  %v842_v22 = vpop.f32.mrb[15].mxu0  ;;  %v317_v23 = vmul.f32 %v1384_v19, %v1384_v19 }
 0x13b   :  { %v1391_v24 = vsub.f32 %v1265_v33, %v272_v21  ;;  %939 = vmatmul.mubr.f32.gmra.mrb[12].mxu1 %v317_v23 }
 0x13c   :  { %v191_v25 = vpop.f32.mrb[16].mxu0  ;;  %941 = vmatprep.mubr.msk.f32.mxu1 %vm1168_vm0, %v1169_v1 }
 0x13d   :  { %v273_v26 = vmul.f32 0.03125, %v191_v25  ;;  %v845_v27 = vpop.f32.mrb[17].mxu0  ;;  %v318_v28 = vmul.f32 %v1391_v24, %v1391_v24 }
 0x13f   :  { %v1398_v29 = vsub.f32 %v1270_v34, %v273_v26  ;;  %942 = vmatmul.mubr.f32.gmra.mrb[14].mxu1 %v318_v28 }
 0x140   :  { %v196_v30 = vpop.f32.mrb[18].mxu0  ;;  %944 = vmatprep.mubr.msk.f32.mxu1 %vm1168_vm0, %v1169_v1 }
 0x141   :  { %v274_v31 = vmul.f32 0.03125, %v196_v30  ;;  %v848_v32 = vpop.f32.mrb[19].mxu0  ;;  %v319_v33 = vmul.f32 %v1398_v29, %v1398_v29 }
 0x143   :  { %v1405_v49 = vsub.f32 %v1275_v35, %v274_v31  ;;  %945 = vmatmul.mubr.f32.gmra.mrb[16].mxu1 %v319_v33 }
 0x144   :  { %v201_v50 = vpop.f32.mrb[20].mxu0  ;;  %947 = vmatprep.mubr.msk.f32.mxu1 %vm1168_vm0, %v1169_v1 }
 0x145   :  { %v275_v34 = vmul.f32 0.03125, %v201_v50  ;;  %v851_v51 = vpop.f32.mrb[21].mxu0  ;;  %v320_v53 = vmul.f32 %v1405_v49, %v1405_v49 }
 0x147   :  { %v1412_v54 = vsub.f32 %v1280_v36, %v275_v34  ;;  %948 = vmatmul.mubr.f32.gmra.mrb[18].mxu1 %v320_v53 }
 0x148   :  { %v206_v55 = vpop.f32.mrb[22].mxu0  ;;  %950 = vmatprep.mubr.msk.f32.mxu1 %vm1168_vm0, %v1169_v1 }
 0x149   :  { %v276_v35 = vmul.f32 0.03125, %v206_v55  ;;  %v854_v56 = vpop.f32.mrb[23].mxu0  ;;  %v321_v58 = vmul.f32 %v1412_v54, %v1412_v54 }
 0x14b   :  { %v1419_v59 = vsub.f32 %v1285_v37, %v276_v35  ;;  %951 = vmatmul.mubr.f32.gmra.mrb[20].mxu1 %v321_v58 }
 0x14c   :  { %v211_v60 = vpop.f32.mrb[24].mxu0  ;;  %953 = vmatprep.mubr.msk.f32.mxu1 %vm1168_vm0, %v1169_v1 }
 0x14d   :  { %v277_v36 = vmul.f32 0.03125, %v211_v60  ;;  %v857_v61 = vpop.f32.mrb[25].mxu0  ;;  %v322_v63 = vmul.f32 %v1419_v59, %v1419_v59 }
 0x14f   :  { %v1426_v0 = vsub.f32 %v1290_v38, %v277_v36  ;;  %954 = vmatmul.mubr.f32.gmra.mrb[22].mxu1 %v322_v63 }
 0x150   :  { %v216_v2 = vpop.f32.mrb[26].mxu0  ;;  %956 = vmatprep.mubr.msk.f32.mxu1 %vm1168_vm0, %v1169_v1 }
 0x151   :  { %v278_v37 = vmul.f32 0.03125, %v216_v2  ;;  %v860_v3 = vpop.f32.mrb[27].mxu0  ;;  %v323_v5 = vmul.f32 %v1426_v0, %v1426_v0 }
 0x153   :  { %v1433_v6 = vsub.f32 %v1295_v39, %v278_v37  ;;  %957 = vmatmul.mubr.f32.gmra.mrb[24].mxu1 %v323_v5 }
 0x154   :  { %v221_v7 = vpop.f32.mrb[28].mxu0  ;;  %959 = vmatprep.mubr.msk.f32.mxu1 %vm1168_vm0, %v1169_v1 }
 0x155   :  { %v279_v38 = vmul.f32 0.03125, %v221_v7  ;;  %v863_v8 = vpop.f32.mrb[29].mxu0  ;;  %v324_v10 = vmul.f32 %v1433_v6, %v1433_v6 }
 0x157   :  { %v1440_v11 = vsub.f32 %v1300_v40, %v279_v38  ;;  %960 = vmatmul.mubr.f32.gmra.mrb[26].mxu1 %v324_v10 }
 0x158   :  { %v226_v12 = vpop.f32.mrb[30].mxu0  ;;  %962 = vmatprep.mubr.msk.f32.mxu1 %vm1168_vm0, %v1169_v1 }
 0x159   :  { %v280_v39 = vmul.f32 0.03125, %v226_v12  ;;  %v866_v13 = vpop.f32.mrb[31].mxu0  ;;  %v325_v15 = vmul.f32 %v1440_v11, %v1440_v11 }
 0x15b   :  { %v1447_v16 = vsub.f32 %v1305_v41, %v280_v39  ;;  %963 = vmatmul.mubr.f32.gmra.mrb[28].mxu1 %v325_v15 }
 0x15c   :  { %v231_v17 = vpop.f32.mrb[32].mxu0  ;;  %965 = vmatprep.mubr.msk.f32.mxu1 %vm1168_vm0, %v1169_v1 }
 0x15d   :  { %v281_v40 = vmul.f32 0.03125, %v231_v17  ;;  %v869_v18 = vpop.f32.mrb[33].mxu0  ;;  %v326_v20 = vmul.f32 %v1447_v16, %v1447_v16 }
 0x15f   :  { %v1454_v21 = vsub.f32 %v1310_v42, %v281_v40  ;;  %966 = vmatmul.mubr.f32.gmra.mrb[30].mxu1 %v326_v20 }
 0x160   :  { %v236_v22 = vpop.f32.mrb[34].mxu0  ;;  %968 = vmatprep.mubr.msk.f32.mxu1 %vm1168_vm0, %v1169_v1 }
 0x161   :  { %v282_v41 = vmul.f32 0.03125, %v236_v22  ;;  %v872_v23 = vpop.f32.mrb[35].mxu0  ;;  %v327_v25 = vmul.f32 %v1454_v21, %v1454_v21  ;;  %v1505_v22 = vld [vmem:[%s1597_s1] ss:$0 sm:$0xff]  ;;  %s1170_s1 = smov [#allocation7]  }
 0x163   :  { %v1461_v26 = vsub.f32 %v1315_v43, %v282_v41  ;;  %969 = vmatmul.mubr.f32.gmra.mrb[32].mxu1 %v327_v25 }
 0x164   :  { %v241_v27 = vpop.f32.mrb[36].mxu0  ;;  %971 = vmatprep.mubr.msk.f32.mxu1 %vm1168_vm0, %v1169_v1 }
 0x165   :  { %v283_v42 = vmul.f32 0.03125, %v241_v27  ;;  %v875_v28 = vpop.f32.mrb[37].mxu0  ;;  %v328_v30 = vmul.f32 %v1461_v26, %v1461_v26  ;;  %v1511_v27 = vld [vmem:[%s1598_s2] ss:$0 sm:$0xff]  ;;  %s694_s2 = sshll.u32 %s1170_s1, 4  ;;  %s695_s2 = int_to_ptr.vmem [resolvable:$true] %s694_s2 }
 0x166   :  { %s1135_s17 = scalar_lea.vmem %s695_s2, 2944  ;;  %p1140_p3 = scmp.lt.s32.totalorder %s695_s2, %s695_s2 }
 0x167   :  { %v1468_v31 = vsub.f32 %v1320_v44, %v283_v42  ;;  %972 = vmatmul.mubr.f32.gmra.mrb[34].mxu1 %v328_v30  ;;  %p1136_p2 = scmp.ne.s32.totalorder %s695_s2, %s1135_s17  ;;  %p1141_p4 = scmp.lt.s32.totalorder %s1135_s17, %s1135_s17 }
 0x168   :  { %v246_v32 = vpop.f32.mrb[38].mxu0  ;;  %974 = vmatprep.mubr.msk.f32.mxu1 %vm1168_vm0, %v1169_v1 }
 0x169   :  { %v284_v43 = vmul.f32 0.03125, %v246_v32  ;;  %v878_v33 = vpop.f32.mrb[39].mxu0  ;;  %v329_v50 = vmul.f32 %v1468_v31, %v1468_v31  ;;  %p1142_p5 = por %p1141_p4, %p1140_p3 }
 0x16b   :  { %v1475_v34 = vsub.f32 %v1325_v45, %v284_v43  ;;  %975 = vmatmul.mubr.f32.gmra.mrb[36].mxu1 %v329_v50  ;;  %p1143_p6 = pnand %p1142_p5, %p1136_p2 }
 0x16c   :  { %v251_v51 = vpop.f32.mrb[40].mxu0  ;;  %977 = vmatprep.mubr.msk.f32.mxu1 %vm1168_vm0, %v1169_v1 }
 0x16d   :  { %v285_v44 = vmul.f32 0.03125, %v251_v51  ;;  %v881_v53 = vpop.f32.mrb[41].mxu0  ;;  %v330_v55 = vmul.f32 %v1475_v34, %v1475_v34 }
 0x16f   :  { %v1482_v35 = vsub.f32 %v1330_v46, %v285_v44  ;;  %978 = vmatmul.mubr.f32.gmra.mrb[38].mxu1 %v330_v55 }
 0x170   :  { %v256_v56 = vpop.f32.mrb[42].mxu0  ;;  %980 = vmatprep.mubr.msk.f32.mxu1 %vm1168_vm0, %v1169_v1 }
 0x171   :  { %v286_v45 = vmul.f32 0.03125, %v256_v56  ;;  %v884_v58 = vpop.f32.mrb[43].mxu0  ;;  %v331_v60 = vmul.f32 %v1482_v35, %v1482_v35 }
 0x173   :  { %v1489_v36 = vsub.f32 %v1335_v47, %v286_v45  ;;  %981 = vmatmul.mubr.f32.gmra.mrb[40].mxu1 %v331_v60 }
 0x174   :  { %v261_v61 = vpop.f32.mrb[44].mxu0  ;;  %983 = vmatprep.mubr.msk.f32.mxu1 %vm1168_vm0, %v1169_v1 }
 0x175   :  { %v287_v46 = vmul.f32 0.03125, %v261_v61  ;;  %v887_v63 = vpop.f32.mrb[45].mxu0  ;;  %v332_v2 = vmul.f32 %v1489_v36, %v1489_v36 }
 0x177   :  { %v1496_v37 = vsub.f32 %v1340_v48, %v287_v46  ;;  %984 = vmatmul.mubr.f32.gmra.mrb[42].mxu1 %v332_v2 }
 0x178   :  { %986 = vmatprep.mubr.msk.f32.mxu1 %vm1168_vm0, %v1169_v1 }
 0x179   :  { %v333_v47 = vmul.f32 %v1496_v37, %v1496_v37 }
 0x17b   :  { %987 = vmatmul.mubr.f32.gmra.mrb[44].mxu1 %v333_v47 }
 0x1f6   :  { %v400_v3 = vpop.f32.mrb[0].mxu1 }
 0x1f7   :  { %v514_v5 = vmul.f32 0.03125, %v400_v3  ;;  %v922_v7 = vpop.f32.mrb[1].mxu1 }
 0x1f9   :  { %v537_v38 = vadd.f32 1e-05, %v514_v5 }
 0x1fa   :  { %v405_v8 = vpop.f32.mrb[2].mxu1 }
 0x1fb   :  { %1045 = vrsqrt.f32 %v537_v38  ;;  %v515_v10 = vmul.f32 0.03125, %v405_v8  ;;  %v925_v12 = vpop.f32.mrb[3].mxu1 }
 0x1fd   :  { %v538_v39 = vadd.f32 1e-05, %v515_v10 }
 0x1fe   :  { %v410_v13 = vpop.f32.mrb[4].mxu1 }
 0x1ff   :  { %1047 = vrsqrt.f32 %v538_v39  ;;  %v516_v48 = vmul.f32 0.03125, %v410_v13  ;;  %v928_v15 = vpop.f32.mrb[5].mxu1 }
 0x201   :  { %v539_v17 = vadd.f32 1e-05, %v516_v48 }
 0x202   :  { %v415_v40 = vpop.f32.mrb[6].mxu1 }
 0x203   :  { %1049 = vrsqrt.f32 %v539_v17  ;;  %v517_v1 = vmul.f32 0.03125, %v415_v40  ;;  %v931_v18 = vpop.f32.mrb[7].mxu1 }
 0x205   :  { %v1046_v20 = vpop.eup %1045  ;;  %v540_v41 = vadd.f32 1e-05, %v517_v1 }
 0x206   :  { %v583_v23 = vmul.f32 %v1046_v20, %v1344_v52  ;;  %v420_v25 = vpop.f32.mrb[8].mxu1 }
 0x207   :  { %1051 = vrsqrt.f32 %v540_v41  ;;  %v518_v42 = vmul.f32 0.03125, %v420_v25  ;;  %v934_v28 = vpop.f32.mrb[9].mxu1 }
 0x208   :  { %v613_v30 = vmul.f32 %v1505_v22, %v583_v23 }
 0x209   :  { %v1048_v32 = vpop.eup %1047  ;;  %v541_v43 = vadd.f32 1e-05, %v518_v42 }
 0x20a   :  { %v643_v33 = vadd.f32 %v1511_v27, %v613_v30  ;;  %v584_v50 = vmul.f32 %v1048_v32, %v1349_v57  ;;  %v425_v51 = vpop.f32.mrb[10].mxu1 }
 0x20b   :  { %1053 = vrsqrt.f32 %v541_v43  ;;  %v519_v52 = vmul.f32 0.03125, %v425_v51  ;;  %v937_v44 = vpop.f32.mrb[11].mxu1 }
 0x20c   :  { %666 = vst [vmem:[#allocation7] sm:$0xff] %v643_v33  ;;  %v614_v53 = vmul.f32 %v1505_v22, %v584_v50 }
 0x20d   :  { %v1050_v55 = vpop.eup %1049  ;;  %v542_v56 = vadd.f32 1e-05, %v519_v52 }
 0x20e   :  { %v644_v45 = vadd.f32 %v1511_v27, %v614_v53  ;;  %v585_v58 = vmul.f32 %v1050_v55, %v1356_v62  ;;  %v430_v60 = vpop.f32.mrb[12].mxu1 }
 0x20f   :  { %1055 = vrsqrt.f32 %v542_v56  ;;  %v520_v61 = vmul.f32 0.03125, %v430_v60  ;;  %v940_v46 = vpop.f32.mrb[13].mxu1 }
 0x210   :  { %667 = vst [vmem:[#allocation7 + $0x8] sm:$0xff] %v644_v45  ;;  %v615_v57 = vmul.f32 %v1505_v22, %v585_v58 }
 0x211   :  { %v1052_v63 = vpop.eup %1051  ;;  %v543_v2 = vadd.f32 1e-05, %v520_v61 }
 0x212   :  { %v645_v47 = vadd.f32 %v1511_v27, %v615_v57  ;;  %v586_v3 = vmul.f32 %v1052_v63, %v1363_v4  ;;  %v435_v5 = vpop.f32.mrb[14].mxu1 }
 0x213   :  { %1057 = vrsqrt.f32 %v543_v2  ;;  %v521_v7 = vmul.f32 0.03125, %v435_v5  ;;  %v943_v38 = vpop.f32.mrb[15].mxu1 }
 0x214   :  { %668 = vst [vmem:[#allocation7 + $0x10] sm:$0xff] %v645_v47  ;;  %v616_v62 = vmul.f32 %v1505_v22, %v586_v3 }
 0x215   :  { %v1054_v8 = vpop.eup %1053  ;;  %v544_v10 = vadd.f32 1e-05, %v521_v7 }
 0x216   :  { %v646_v12 = vadd.f32 %v1511_v27, %v616_v62  ;;  %v587_v39 = vmul.f32 %v1054_v8, %v1370_v9  ;;  %v440_v13 = vpop.f32.mrb[16].mxu1 }
 0x217   :  { %1059 = vrsqrt.f32 %v544_v10  ;;  %v522_v48 = vmul.f32 0.03125, %v440_v13  ;;  %v946_v15 = vpop.f32.mrb[17].mxu1 }
 0x218   :  { %669 = vst [vmem:[#allocation7 + $0x18] sm:$0xff] %v646_v12  ;;  %v617_v4 = vmul.f32 %v1505_v22, %v587_v39 }
 0x219   :  { %v1056_v17 = vpop.eup %1055  ;;  %v545_v40 = vadd.f32 1e-05, %v522_v48 }
 0x21a   :  { %v647_v1 = vadd.f32 %v1511_v27, %v617_v4  ;;  %v588_v18 = vmul.f32 %v1056_v17, %v1377_v14  ;;  %v445_v20 = vpop.f32.mrb[18].mxu1 }
 0x21b   :  { %1061 = vrsqrt.f32 %v545_v40  ;;  %v523_v41 = vmul.f32 0.03125, %v445_v20  ;;  %v949_v23 = vpop.f32.mrb[19].mxu1 }
 0x21c   :  { %670 = vst [vmem:[#allocation7 + $0x20] sm:$0xff] %v647_v1  ;;  %v618_v9 = vmul.f32 %v1505_v22, %v588_v18 }
 0x21d   :  { %v1058_v25 = vpop.eup %1057  ;;  %v546_v42 = vadd.f32 1e-05, %v523_v41 }
 0x21e   :  { %v648_v28 = vadd.f32 %v1511_v27, %v618_v9  ;;  %v589_v30 = vmul.f32 %v1058_v25, %v1384_v19  ;;  %v450_v32 = vpop.f32.mrb[20].mxu1 }
 0x21f   :  { %1063 = vrsqrt.f32 %v546_v42  ;;  %v524_v43 = vmul.f32 0.03125, %v450_v32  ;;  %v952_v33 = vpop.f32.mrb[21].mxu1 }
 0x220   :  { %671 = vst [vmem:[#allocation7 + $0x28] sm:$0xff] %v648_v28  ;;  %v619_v14 = vmul.f32 %v1505_v22, %v589_v30 }
 0x221   :  { %v1060_v50 = vpop.eup %1059  ;;  %v547_v51 = vadd.f32 1e-05, %v524_v43 }
 0x222   :  { %v649_v52 = vadd.f32 %v1511_v27, %v619_v14  ;;  %v590_v44 = vmul.f32 %v1060_v50, %v1391_v24  ;;  %v455_v53 = vpop.f32.mrb[22].mxu1 }
 0x223   :  { %1065 = vrsqrt.f32 %v547_v51  ;;  %v525_v55 = vmul.f32 0.03125, %v455_v53  ;;  %v955_v56 = vpop.f32.mrb[23].mxu1 }
 0x224   :  { %672 = vst [vmem:[#allocation7 + $0x30] sm:$0xff] %v649_v52  ;;  %v620_v19 = vmul.f32 %v1505_v22, %v590_v44 }
 0x225   :  { %v1062_v45 = vpop.eup %1061  ;;  %v548_v58 = vadd.f32 1e-05, %v525_v55 }
 0x226   :  { %v650_v60 = vadd.f32 %v1511_v27, %v620_v19  ;;  %v591_v61 = vmul.f32 %v1062_v45, %v1398_v29  ;;  %v460_v46 = vpop.f32.mrb[24].mxu1 }
 0x227   :  { %1067 = vrsqrt.f32 %v548_v58  ;;  %v526_v57 = vmul.f32 0.03125, %v460_v46  ;;  %v958_v63 = vpop.f32.mrb[25].mxu1 }
 0x228   :  { %673 = vst [vmem:[#allocation7 + $0x38] sm:$0xff] %v650_v60  ;;  %v621_v24 = vmul.f32 %v1505_v22, %v591_v61 }
 0x229   :  { %v1064_v2 = vpop.eup %1063  ;;  %v549_v47 = vadd.f32 1e-05, %v526_v57 }
 0x22a   :  { %v651_v3 = vadd.f32 %v1511_v27, %v621_v24  ;;  %v592_v5 = vmul.f32 %v1064_v2, %v1405_v49  ;;  %v465_v7 = vpop.f32.mrb[26].mxu1 }
 0x22b   :  { %1069 = vrsqrt.f32 %v549_v47  ;;  %v527_v38 = vmul.f32 0.03125, %v465_v7  ;;  %v961_v62 = vpop.f32.mrb[27].mxu1 }
 0x22c   :  { %674 = vst [vmem:[#allocation7 + $0x40] sm:$0xff] %v651_v3  ;;  %v622_v29 = vmul.f32 %v1505_v22, %v592_v5 }
 0x22d   :  { %v1066_v8 = vpop.eup %1065  ;;  %v550_v10 = vadd.f32 1e-05, %v527_v38 }
 0x22e   :  { %v652_v12 = vadd.f32 %v1511_v27, %v622_v29  ;;  %v593_v39 = vmul.f32 %v1066_v8, %v1412_v54  ;;  %v470_v13 = vpop.f32.mrb[28].mxu1 }
 0x22f   :  { %1071 = vrsqrt.f32 %v550_v10  ;;  %v528_v48 = vmul.f32 0.03125, %v470_v13  ;;  %v964_v15 = vpop.f32.mrb[29].mxu1 }
 0x230   :  { %675 = vst [vmem:[#allocation7 + $0x48] sm:$0xff] %v652_v12  ;;  %v623_v49 = vmul.f32 %v1505_v22, %v593_v39 }
 0x231   :  { %v1068_v4 = vpop.eup %1067  ;;  %v551_v17 = vadd.f32 1e-05, %v528_v48 }
 0x232   :  { %v653_v40 = vadd.f32 %v1511_v27, %v623_v49  ;;  %v594_v1 = vmul.f32 %v1068_v4, %v1419_v59  ;;  %v475_v18 = vpop.f32.mrb[30].mxu1 }
 0x233   :  { %1073 = vrsqrt.f32 %v551_v17  ;;  %v529_v20 = vmul.f32 0.03125, %v475_v18  ;;  %v967_v41 = vpop.f32.mrb[31].mxu1 }
 0x234   :  { %676 = vst [vmem:[#allocation7 + $0x50] sm:$0xff] %v653_v40  ;;  %v624_v54 = vmul.f32 %v1505_v22, %v594_v1 }
 0x235   :  { %v1070_v23 = vpop.eup %1069  ;;  %v552_v9 = vadd.f32 1e-05, %v529_v20 }
 0x236   :  { %v654_v25 = vadd.f32 %v1511_v27, %v624_v54  ;;  %v595_v42 = vmul.f32 %v1070_v23, %v1426_v0  ;;  %v480_v28 = vpop.f32.mrb[32].mxu1 }
 0x237   :  { %1075 = vrsqrt.f32 %v552_v9  ;;  %v530_v30 = vmul.f32 0.03125, %v480_v28  ;;  %v970_v32 = vpop.f32.mrb[33].mxu1 }
 0x238   :  { %677 = vst [vmem:[#allocation7 + $0x58] sm:$0xff] %v654_v25  ;;  %v625_v59 = vmul.f32 %v1505_v22, %v595_v42 }
 0x239   :  { %v1072_v43 = vpop.eup %1071  ;;  %v553_v33 = vadd.f32 1e-05, %v530_v30 }
 0x23a   :  { %v655_v14 = vadd.f32 %v1511_v27, %v625_v59  ;;  %v596_v50 = vmul.f32 %v1072_v43, %v1433_v6  ;;  %v485_v51 = vpop.f32.mrb[34].mxu1 }
 0x23b   :  { %1077 = vrsqrt.f32 %v553_v33  ;;  %v531_v52 = vmul.f32 0.03125, %v485_v51  ;;  %v973_v44 = vpop.f32.mrb[35].mxu1 }
 0x23c   :  { %678 = vst [vmem:[#allocation7 + $0x60] sm:$0xff] %v655_v14  ;;  %v626_v0 = vmul.f32 %v1505_v22, %v596_v50 }
 0x23d   :  { %v1074_v53 = vpop.eup %1073  ;;  %v554_v55 = vadd.f32 1e-05, %v531_v52 }
 0x23e   :  { %v656_v56 = vadd.f32 %v1511_v27, %v626_v0  ;;  %v597_v19 = vmul.f32 %v1074_v53, %v1440_v11  ;;  %v490_v45 = vpop.f32.mrb[36].mxu1 }
 0x23f   :  { %1079 = vrsqrt.f32 %v554_v55  ;;  %v532_v58 = vmul.f32 0.03125, %v490_v45  ;;  %v976_v60 = vpop.f32.mrb[37].mxu1 }
 0x240   :  { %679 = vst [vmem:[#allocation7 + $0x68] sm:$0xff] %v656_v56  ;;  %v627_v6 = vmul.f32 %v1505_v22, %v597_v19 }
 0x241   :  { %v1076_v61 = vpop.eup %1075  ;;  %v555_v46 = vadd.f32 1e-05, %v532_v58 }
 0x242   :  { %v657_v57 = vadd.f32 %v1511_v27, %v627_v6  ;;  %v598_v63 = vmul.f32 %v1076_v61, %v1447_v16  ;;  %v495_v24 = vpop.f32.mrb[38].mxu1 }
 0x243   :  { %1081 = vrsqrt.f32 %v555_v46  ;;  %v533_v2 = vmul.f32 0.03125, %v495_v24  ;;  %v979_v47 = vpop.f32.mrb[39].mxu1 }
 0x244   :  { %680 = vst [vmem:[#allocation7 + $0x70] sm:$0xff] %v657_v57  ;;  %v628_v11 = vmul.f32 %v1505_v22, %v598_v63 }
 0x245   :  { %v1078_v3 = vpop.eup %1077  ;;  %v556_v5 = vadd.f32 1e-05, %v533_v2 }
 0x246   :  { %v658_v7 = vadd.f32 %v1511_v27, %v628_v11  ;;  %v599_v38 = vmul.f32 %v1078_v3, %v1454_v21  ;;  %v500_v62 = vpop.f32.mrb[40].mxu1 }
 0x247   :  { %1083 = vrsqrt.f32 %v556_v5  ;;  %v534_v29 = vmul.f32 0.03125, %v500_v62  ;;  %v982_v8 = vpop.f32.mrb[41].mxu1 }
 0x248   :  { %681 = vst [vmem:[#allocation7 + $0x78] sm:$0xff] %v658_v7  ;;  %v629_v16 = vmul.f32 %v1505_v22, %v599_v38 }
 0x249   :  { %v1080_v10 = vpop.eup %1079  ;;  %v557_v12 = vadd.f32 1e-05, %v534_v29 }
 0x24a   :  { %v659_v39 = vadd.f32 %v1511_v27, %v629_v16  ;;  %v600_v13 = vmul.f32 %v1080_v10, %v1461_v26  ;;  %v505_v48 = vpop.f32.mrb[42].mxu1 }
 0x24b   :  { %1085 = vrsqrt.f32 %v557_v12  ;;  %v535_v15 = vmul.f32 0.03125, %v505_v48  ;;  %v985_v49 = vpop.f32.mrb[43].mxu1 }
 0x24c   :  { %682 = vst [vmem:[#allocation7 + $0x80] sm:$0xff] %v659_v39  ;;  %v630_v21 = vmul.f32 %v1505_v22, %v600_v13 }
 0x24d   :  { %v1082_v4 = vpop.eup %1081  ;;  %v558_v17 = vadd.f32 1e-05, %v535_v15 }
 0x24e   :  { %v660_v40 = vadd.f32 %v1511_v27, %v630_v21  ;;  %v601_v1 = vmul.f32 %v1082_v4, %v1468_v31  ;;  %v510_v18 = vpop.f32.mrb[44].mxu1 }
 0x24f   :  { %1087 = vrsqrt.f32 %v558_v17  ;;  %v536_v20 = vmul.f32 0.03125, %v510_v18  ;;  %v988_v41 = vpop.f32.mrb[45].mxu1 }
 0x250   :  { %683 = vst [vmem:[#allocation7 + $0x88] sm:$0xff] %v660_v40  ;;  %v631_v26 = vmul.f32 %v1505_v22, %v601_v1 }
 0x251   :  { %v1084_v54 = vpop.eup %1083  ;;  %v559_v23 = vadd.f32 1e-05, %v536_v20 }
 0x252   :  { %v661_v9 = vadd.f32 %v1511_v27, %v631_v26  ;;  %v602_v25 = vmul.f32 %v1084_v54, %v1475_v34 }
 0x253   :  { %1089 = vrsqrt.f32 %v559_v23 }
 0x254   :  { %684 = vst [vmem:[#allocation7 + $0x90] sm:$0xff] %v661_v9  ;;  %v632_v42 = vmul.f32 %v1505_v22, %v602_v25 }
 0x255   :  { %v1086_v28 = vpop.eup %1085 }
 0x256   :  { %v662_v31 = vadd.f32 %v1511_v27, %v632_v42  ;;  %v603_v30 = vmul.f32 %v1086_v28, %v1482_v35 }
 0x258   :  { %685 = vst [vmem:[#allocation7 + $0x98] sm:$0xff] %v662_v31  ;;  %v633_v32 = vmul.f32 %v1505_v22, %v603_v30 }
 0x259   :  { %v1088_v59 = vpop.eup %1087 }
 0x25a   :  { %v663_v43 = vadd.f32 %v1511_v27, %v633_v32  ;;  %v604_v33 = vmul.f32 %v1088_v59, %v1489_v36 }
 0x25c   :  { %686 = vst [vmem:[#allocation7 + $0xa0] sm:$0xff] %v663_v43  ;;  %v634_v34 = vmul.f32 %v1505_v22, %v604_v33 }
 0x25d   :  { %v1090_v14 = vpop.eup %1089 }
 0x25e   :  { %v664_v50 = vadd.f32 %v1511_v27, %v634_v34  ;;  %v605_v51 = vmul.f32 %v1090_v14, %v1496_v37 }
 0x260   :  { %687 = vst [vmem:[#allocation7 + $0xa8] sm:$0xff] %v664_v50  ;;  %v635_v35 = vmul.f32 %v1505_v22, %v605_v51 }
 0x262   :  { %v665_v52 = vadd.f32 %v1511_v27, %v635_v35 }
 0x264   :  { %688 = vst [vmem:[#allocation7 + $0xb0] sm:$0xff] %v665_v52 }
 0x265   :  { %1146 = shalt.err (!%p1143_p6)
}
 0x266   :  { %s1147_s20 = scalar_lea.hbm %s1600_s4, 2944 }
 0x267   :  { %p1148_p7 = scmp.ne.s32.totalorder %s1600_s4, %s1147_s20  ;;  %p1151_p8 = scmp.lt.u32.totalorder %s1147_s20, %s1600_s4 }
 0x269   :  { %p1153_p9 = pnand %p1151_p8, %p1148_p7 }
 0x26b   :  { %1156 = shalt.err (!%p1153_p9)
}
 0x26c   :  { %700 = dma.vmem_to_hbm [thread:$0]  %s695_s2, 2944, %s1600_s4, [#allocation4], %s1164_s25, %s1164_s25, %s1165_s26  }
 0x26d   :  { %1161 = dma.done.wait [#allocation4], 2944  }
 0x26e   :  { %1162 = vsyncadd [#allocation4], 4294964352 }
 0x26f   :  { %704 = vsyncpa [#allocation3], 1 }
 0x270   :  { %705 = vsyncpa [#allocation6], 1 }
 0x271   :  { %706 = vsyncpa [#allocation4], 1 }

</bundles_post_ra>
